<compile_context>
chip_gen: v7x
topology: tpu7x:2x2x1
jax: 0.10.0
libtpu: 0.0.40
codegen_flags: <defaults>
</compile_context>

<pallas_src>
import jax
import jax.numpy as jnp
from jax.experimental import pallas as pl
from jax.experimental.pallas import tpu as pltpu


_INV_SQRT2 = 0.7071067811865476  # 1/sqrt(2), hoisted constant


def _gelu_exact(x):
    # Matches torch.nn.GELU() default (erf-based, non-approximate), f32 math.
    return 0.5 * x * (1.0 + jax.lax.erf(x * _INV_SQRT2))


def dino_head_kernel(x_ref, w1_ref, b1_ref, w2_ref, b2_ref, w3_ref, b3_ref,
                     wl_ref, o_ref, z_ref):
    """One (batch-tile i, out-tile j) grid step."""
    mm_dtype = w1_ref.dtype  # MXU input dtype (bf16 in production)

    # The MLP + L2-normalize only depends on the batch tile: compute it once
    # (first out_dim tile) and cache the normalized bottleneck activations.
    @pl.when(pl.program_id(1) == 0)
    def _compute_mlp():
        x = x_ref[...].astype(mm_dtype)
        h = jnp.dot(x, w1_ref[...], preferred_element_type=jnp.float32)
        h = _gelu_exact(h + b1_ref[...])
        h = jnp.dot(h.astype(mm_dtype), w2_ref[...],
                    preferred_element_type=jnp.float32)
        h = _gelu_exact(h + b2_ref[...])
        z = jnp.dot(h.astype(mm_dtype), w3_ref[...],
                    preferred_element_type=jnp.float32) + b3_ref[...]
        # F.normalize(z, dim=-1, p=2, eps=1e-12): z / max(||z||, eps)
        #   == z * rsqrt(max(sum(z*z), eps**2))   (rsqrt lands on the EUP slot)
        sumsq = jnp.sum(z * z, axis=-1, keepdims=True)
        z_ref[...] = z * jax.lax.rsqrt(jnp.maximum(sumsq, 1e-24))

    # Weight-normed last layer (bias-free); effective weight already baked in.
    o_ref[...] = jnp.dot(z_ref[...].astype(wl_ref.dtype), wl_ref[...],
                         preferred_element_type=jnp.float32).astype(o_ref.dtype)


def _vmem_capacity_bytes():
    try:
        return int(pltpu.get_tpu_info().vmem_capacity_bytes)
    except Exception:
        return 64 * 1024 * 1024  # conservative default (v7x per-TensorCore)


def dino_head_forward(x, params, *, tm=None, tn=None):
    """x: (B, in_dim) float32. Returns (B, out_dim) float32."""
    w1, b1, w2, b2, w3, b3, w_last = params
    B, in_dim = x.shape
    hidden = w1.shape[1]
    bottleneck = w3.shape[1]
    out_dim = w_last.shape[1]

    vmem_cap = _vmem_capacity_bytes()

    # Tile sizes: TM on sublanes (multiple of 8 or full batch), TN on lanes
    # (multiple of 128 or full out_dim). Bigger TN on 128 MiB VMEM parts
    # (v5e/v6e), smaller on 64 MiB v7x.
    if tm is None:
        tm = B if B <= 256 else 256
    if tn is None:
        tn_target = 8192 if vmem_cap >= (96 << 20) else 4096
        tn = out_dim if out_dim <= tn_target else tn_target
    grid = (pl.cdiv(B, tm), pl.cdiv(out_dim, tn))

    def _nbytes(a):
        return int(a.size) * a.dtype.itemsize

    # Rough scoped-VMEM budget: resident MLP weights (x2 for default
    # double-buffering), streamed x / w_last / output tiles (x2), z scratch.
    resident = sum(_nbytes(a) for a in (w1, b1, w2, b2, w3, b3))
    streamed = (2 * tm * in_dim * x.dtype.itemsize
                + 2 * bottleneck * tn * w_last.dtype.itemsize
                + 2 * tm * tn * 4
                + tm * bottleneck * 4)
    vmem_limit = int(min(max(2 * resident + streamed + (2 << 20), 32 << 20),
                         int(vmem_cap * 0.9)))

    # Advisory cost estimate so XLA can overlap surrounding ops.
    flops = 2 * B * (in_dim * hidden + hidden * hidden
                     + hidden * bottleneck + bottleneck * out_dim)
    transcendentals = 2 * B * hidden + B          # two GELU layers + rsqrt
    bytes_accessed = (_nbytes(x) + resident + _nbytes(w_last) + B * out_dim * 4)
    cost = pl.CostEstimate(flops=flops, transcendentals=transcendentals,
                           bytes_accessed=bytes_accessed)

    return pl.pallas_call(
        dino_head_kernel,
        out_shape=jax.ShapeDtypeStruct((B, out_dim), jnp.float32),
        grid=grid,
        in_specs=[
            pl.BlockSpec((tm, in_dim), lambda i, j: (i, 0)),         # x tile
            pl.BlockSpec((in_dim, hidden), lambda i, j: (0, 0)),     # w1 (resident)
            pl.BlockSpec((1, hidden), lambda i, j: (0, 0)),          # b1
            pl.BlockSpec((hidden, hidden), lambda i, j: (0, 0)),     # w2 (resident)
            pl.BlockSpec((1, hidden), lambda i, j: (0, 0)),          # b2
            pl.BlockSpec((hidden, bottleneck), lambda i, j: (0, 0)), # w3 (resident)
            pl.BlockSpec((1, bottleneck), lambda i, j: (0, 0)),      # b3
            pl.BlockSpec((bottleneck, tn), lambda i, j: (0, j)),     # w_last stream
        ],
        out_specs=pl.BlockSpec((tm, tn), lambda i, j: (i, j)),
        scratch_shapes=[pltpu.VMEM((tm, bottleneck), jnp.float32)],  # cached z
        compiler_params=pltpu.CompilerParams(
            dimension_semantics=("parallel", "arbitrary"),
            vmem_limit_bytes=vmem_limit,
        ),
        cost_estimate=cost,
    )(x, w1, b1, w2, b2, w3, b3, w_last)


def init_params(key, in_dim, out_dim, hidden_dim, bottleneck_dim,
                param_dtype=jnp.bfloat16):
    """Deterministic synthetic init mirroring DINOHead.__init__ shapes.

    PyTorch Linear weights are (out, in); we store them transposed (in, out).
    trunc_normal_(std=0.02) is approximated with a plain normal * 0.02
    (parameter init only; forward semantics are unaffected). Weights are cast
    to `param_dtype` (bf16 by default) for MXU throughput / HBM bandwidth;
    biases stay f32.
    """
    ks = jax.random.split(key, 4)
    w1 = (jax.random.normal(ks[0], (in_dim, hidden_dim), jnp.float32)
          * 0.02).astype(param_dtype)
    b1 = jnp.zeros((1, hidden_dim), jnp.float32)
    w2 = (jax.random.normal(ks[1], (hidden_dim, hidden_dim), jnp.float32)
          * 0.02).astype(param_dtype)
    b2 = jnp.zeros((1, hidden_dim), jnp.float32)
    w3 = (jax.random.normal(ks[2], (hidden_dim, bottleneck_dim), jnp.float32)
          * 0.02).astype(param_dtype)
    b3 = jnp.zeros((1, bottleneck_dim), jnp.float32)

    # Last layer: weight_norm(Linear(bottleneck_dim, out_dim, bias=False)),
    # weight_g filled with 1 => effective weight = v / ||v||_2 (row-wise over
    # the input dim of the PyTorch (out, in) weight).
    v = jax.random.normal(ks[3], (out_dim, bottleneck_dim), jnp.float32)
    v_norm = jnp.sqrt(jnp.sum(v * v, axis=1, keepdims=True))
    w_last_eff = (v / v_norm).T.astype(param_dtype)  # (bottleneck_dim, out_dim)

    return (w1, b1, w2, b2, w3, b3, w_last_eff)


def _reference_forward(x, params):
    """Pure-JAX reference with the same dtype discipline as the kernel."""
    w1, b1, w2, b2, w3, b3, wl = params
    mm = w1.dtype
    f32 = jnp.float32
    h = _gelu_exact(jnp.dot(x.astype(mm), w1, preferred_element_type=f32) + b1)
    h = _gelu_exact(jnp.dot(h.astype(mm), w2, preferred_element_type=f32) + b2)
    z = jnp.dot(h.astype(mm), w3, preferred_element_type=f32) + b3
    z = z * jax.lax.rsqrt(
        jnp.maximum(jnp.sum(z * z, axis=-1, keepdims=True), 1e-24))
    return jnp.dot(z.astype(wl.dtype), wl, preferred_element_type=f32)


if __name__ == "__main__":
    # Small shapes consistent with the module (nlayers=3, use_bn=False).
    # NOTE: toy feature dims (<128 lanes) are test-only; production DINO shapes
    # (hidden=2048, bottleneck=256, out_dim=65536) are naturally lane-dense.
    B, IN_DIM, HIDDEN, BOTTLENECK, OUT_DIM = 16, 32, 64, 32, 256

    key = jax.random.PRNGKey(0)
    kx, kp = jax.random.split(key)
    x = jax.random.normal(kx, (B, IN_DIM), jnp.float32)
    params = init_params(kp, IN_DIM, OUT_DIM, HIDDEN, BOTTLENECK)

    # Force small tiles so the test exercises the real (batch, out_dim) grid,
    # the cached-z pl.when path, and partial-batch-tile handling: grid = (2, 2).
    out = dino_head_forward(x, params, tm=8, tn=128)
    jax.block_until_ready(out)

    ref = _reference_forward(x, params)
    assert out.shape == (B, OUT_DIM)
    assert jnp.allclose(out, ref, atol=2e-3, rtol=2e-3), (
        float(jnp.max(jnp.abs(out - ref))))

    # Also run once with the production (chip-aware) tile selection path.
    out2 = dino_head_forward(x, params)
    jax.block_until_ready(out2)
    assert jnp.allclose(out2, ref, atol=2e-3, rtol=2e-3)

    print("KERNEL_OK")
</pallas_src>

<mosaic_0001>
module attributes {stable_mosaic.version = 11 : i64} {
  func.func @dino_head_kernel(%arg0: i32, %arg1: i32, %arg2: memref<8x32xf32, #tpu.memory_space<vmem>>, %arg3: memref<32x64xbf16, #tpu.memory_space<vmem>>, %arg4: memref<1x64xf32, #tpu.memory_space<vmem>>, %arg5: memref<64x64xbf16, #tpu.memory_space<vmem>>, %arg6: memref<1x64xf32, #tpu.memory_space<vmem>>, %arg7: memref<64x32xbf16, #tpu.memory_space<vmem>>, %arg8: memref<1x32xf32, #tpu.memory_space<vmem>>, %arg9: memref<32x128xbf16, #tpu.memory_space<vmem>>, %arg10: memref<8x128xf32, #tpu.memory_space<vmem>>, %arg11: memref<8x32xf32, #tpu.memory_space<vmem>>) attributes {dimension_semantics = [#tpu.dimension_semantics<parallel>, #tpu.dimension_semantics<arbitrary>], iteration_bounds = array<i64: 2, 2>, scalar_prefetch = 0 : i64, scratch_operands = 1 : i64, tpu.core_type = #tpu.core_type<tc>, window_params = [{transform_indices = @transform_0, window_bounds = array<i64: 8, 32>}, {pipeline_mode = #tpu.pipeline_mode<synchronous>, transform_indices = @transform_1, window_bounds = array<i64: 32, 64>}, {pipeline_mode = #tpu.pipeline_mode<synchronous>, transform_indices = @transform_2, window_bounds = array<i64: 1, 64>}, {pipeline_mode = #tpu.pipeline_mode<synchronous>, transform_indices = @transform_3, window_bounds = array<i64: 64, 64>}, {pipeline_mode = #tpu.pipeline_mode<synchronous>, transform_indices = @transform_4, window_bounds = array<i64: 1, 64>}, {pipeline_mode = #tpu.pipeline_mode<synchronous>, transform_indices = @transform_5, window_bounds = array<i64: 64, 32>}, {pipeline_mode = #tpu.pipeline_mode<synchronous>, transform_indices = @transform_6, window_bounds = array<i64: 1, 32>}, {transform_indices = @transform_7, window_bounds = array<i64: 32, 128>}, {transform_indices = @transform_8, window_bounds = array<i64: 8, 128>}]} {
    %c0_i32 = arith.constant 0 : i32
    %0 = arith.cmpi eq, %arg1, %c0_i32 : i32
    %1 = arith.extui %0 : i1 to i32
    %c0_i32_0 = arith.constant 0 : i32
    %2 = arith.cmpi ne, %1, %c0_i32_0 : i32
    scf.if %2 {
      %c0_6 = arith.constant 0 : index
      %c0_7 = arith.constant 0 : index
      %8 = vector.load %arg2[%c0_6, %c0_7] : memref<8x32xf32, #tpu.memory_space<vmem>>, vector<8x32xf32>
      %9 = arith.truncf %8 : vector<8x32xf32> to vector<8x32xbf16>
      %c0_8 = arith.constant 0 : index
      %c0_9 = arith.constant 0 : index
      %10 = vector.load %arg3[%c0_8, %c0_9] : memref<32x64xbf16, #tpu.memory_space<vmem>>, vector<32x64xbf16>
      %cst_10 = arith.constant dense<0.000000e+00> : vector<8x64xf32>
      %11 = tpu.matmul %9, %10, %cst_10 {dimension_numbers = #tpu.dot_dimension_numbers<[1], [0], [0], [1], [0, 0, 1, 1], [], []>} : vector<8x32xbf16>, vector<32x64xbf16>, vector<8x64xf32> -> vector<8x64xf32>
      %c0_11 = arith.constant 0 : index
      %c0_12 = arith.constant 0 : index
      %12 = vector.load %arg4[%c0_11, %c0_12] : memref<1x64xf32, #tpu.memory_space<vmem>>, vector<1x64xf32>
      %13 = vector.broadcast %12 : vector<1x64xf32> to vector<8x64xf32>
      %14 = arith.addf %11, %13 : vector<8x64xf32>
      %cst_13 = arith.constant 5.000000e-01 : f32
      %15 = vector.broadcast %cst_13 : f32 to vector<8x64xf32>
      %16 = arith.mulf %15, %14 : vector<8x64xf32>
      %cst_14 = arith.constant 0.707106769 : f32
      %17 = vector.broadcast %cst_14 : f32 to vector<8x64xf32>
      %18 = arith.mulf %14, %17 : vector<8x64xf32>
      %19 = math.erf %18 : vector<8x64xf32>
      %cst_15 = arith.constant 1.000000e+00 : f32
      %20 = vector.broadcast %cst_15 : f32 to vector<8x64xf32>
      %21 = arith.addf %20, %19 : vector<8x64xf32>
      %22 = arith.mulf %16, %21 : vector<8x64xf32>
      %23 = arith.truncf %22 : vector<8x64xf32> to vector<8x64xbf16>
      %c0_16 = arith.constant 0 : index
      %c0_17 = arith.constant 0 : index
      %24 = vector.load %arg5[%c0_16, %c0_17] : memref<64x64xbf16, #tpu.memory_space<vmem>>, vector<64x64xbf16>
      %cst_18 = arith.constant dense<0.000000e+00> : vector<8x64xf32>
      %25 = tpu.matmul %23, %24, %cst_18 {dimension_numbers = #tpu.dot_dimension_numbers<[1], [0], [0], [1], [0, 0, 1, 1], [], []>} : vector<8x64xbf16>, vector<64x64xbf16>, vector<8x64xf32> -> vector<8x64xf32>
      %c0_19 = arith.constant 0 : index
      %c0_20 = arith.constant 0 : index
      %26 = vector.load %arg6[%c0_19, %c0_20] : memref<1x64xf32, #tpu.memory_space<vmem>>, vector<1x64xf32>
      %27 = vector.broadcast %26 : vector<1x64xf32> to vector<8x64xf32>
      %28 = arith.addf %25, %27 : vector<8x64xf32>
      %cst_21 = arith.constant 5.000000e-01 : f32
      %29 = vector.broadcast %cst_21 : f32 to vector<8x64xf32>
      %30 = arith.mulf %29, %28 : vector<8x64xf32>
      %cst_22 = arith.constant 0.707106769 : f32
      %31 = vector.broadcast %cst_22 : f32 to vector<8x64xf32>
      %32 = arith.mulf %28, %31 : vector<8x64xf32>
      %33 = math.erf %32 : vector<8x64xf32>
      %cst_23 = arith.constant 1.000000e+00 : f32
      %34 = vector.broadcast %cst_23 : f32 to vector<8x64xf32>
      %35 = arith.addf %34, %33 : vector<8x64xf32>
      %36 = arith.mulf %30, %35 : vector<8x64xf32>
      %37 = arith.truncf %36 : vector<8x64xf32> to vector<8x64xbf16>
      %c0_24 = arith.constant 0 : index
      %c0_25 = arith.constant 0 : index
      %38 = vector.load %arg7[%c0_24, %c0_25] : memref<64x32xbf16, #tpu.memory_space<vmem>>, vector<64x32xbf16>
      %cst_26 = arith.constant dense<0.000000e+00> : vector<8x32xf32>
      %39 = tpu.matmul %37, %38, %cst_26 {dimension_numbers = #tpu.dot_dimension_numbers<[1], [0], [0], [1], [0, 0, 1, 1], [], []>} : vector<8x64xbf16>, vector<64x32xbf16>, vector<8x32xf32> -> vector<8x32xf32>
      %c0_27 = arith.constant 0 : index
      %c0_28 = arith.constant 0 : index
      %40 = vector.load %arg8[%c0_27, %c0_28] : memref<1x32xf32, #tpu.memory_space<vmem>>, vector<1x32xf32>
      %41 = vector.broadcast %40 : vector<1x32xf32> to vector<8x32xf32>
      %42 = arith.addf %39, %41 : vector<8x32xf32>
      %43 = arith.mulf %42, %42 : vector<8x32xf32>
      %cst_29 = arith.constant dense<0.000000e+00> : vector<8xf32>
      %44 = vector.multi_reduction <add>, %43, %cst_29 [1] : vector<8x32xf32> to vector<8xf32>
      %45 = vector.shape_cast %44 : vector<8xf32> to vector<8x1xf32>
      %cst_30 = arith.constant 1.000000e-24 : f32
      %46 = vector.broadcast %cst_30 : f32 to vector<8x1xf32>
      %47 = arith.maximumf %45, %46 : vector<8x1xf32>
      %48 = math.rsqrt %47 : vector<8x1xf32>
      %49 = vector.broadcast %48 : vector<8x1xf32> to vector<8x32xf32>
      %50 = arith.mulf %42, %49 : vector<8x32xf32>
      %c0_31 = arith.constant 0 : index
      %c0_32 = arith.constant 0 : index
      %51 = vector.load %arg11[%c0_31, %c0_32] : memref<8x32xf32, #tpu.memory_space<vmem>>, vector<8x32xf32>
      tpu.vector_store %arg11[%c0_31, %c0_32], %50 {strides = array<i32>} : memref<8x32xf32, #tpu.memory_space<vmem>>, vector<8x32xf32>,
    } else {
    }
    %c0 = arith.constant 0 : index
    %c0_1 = arith.constant 0 : index
    %3 = vector.load %arg11[%c0, %c0_1] : memref<8x32xf32, #tpu.memory_space<vmem>>, vector<8x32xf32>
    %4 = arith.truncf %3 : vector<8x32xf32> to vector<8x32xbf16>
    %c0_2 = arith.constant 0 : index
    %c0_3 = arith.constant 0 : index
    %5 = vector.load %arg9[%c0_2, %c0_3] : memref<32x128xbf16, #tpu.memory_space<vmem>>, vector<32x128xbf16>
    %cst = arith.constant dense<0.000000e+00> : vector<8x128xf32>
    %6 = tpu.matmul %4, %5, %cst {dimension_numbers = #tpu.dot_dimension_numbers<[1], [0], [0], [1], [0, 0, 1, 1], [], []>} : vector<8x32xbf16>, vector<32x128xbf16>, vector<8x128xf32> -> vector<8x128xf32>
    %c0_4 = arith.constant 0 : index
    %c0_5 = arith.constant 0 : index
    %7 = vector.load %arg10[%c0_4, %c0_5] : memref<8x128xf32, #tpu.memory_space<vmem>>, vector<8x128xf32>
    tpu.vector_store %arg10[%c0_4, %c0_5], %6 {strides = array<i32>} : memref<8x128xf32, #tpu.memory_space<vmem>>, vector<8x128xf32>,
    return
  }
  func.func @transform_0(%arg0: i32, %arg1: i32) -> (i32, i32) {
    %c0_i32 = arith.constant 0 : i32
    %c0_i32_0 = arith.constant 0 : i32
    return %arg0, %c0_i32 : i32, i32
  }
  func.func @transform_1(%arg0: i32, %arg1: i32) -> (i32, i32) {
    %c0_i32 = arith.constant 0 : i32
    %c0_i32_0 = arith.constant 0 : i32
    %c0_i32_1 = arith.constant 0 : i32
    return %c0_i32, %c0_i32_0 : i32, i32
  }
  func.func @transform_2(%arg0: i32, %arg1: i32) -> (i32, i32) {
    %c0_i32 = arith.constant 0 : i32
    %c0_i32_0 = arith.constant 0 : i32
    %c0_i32_1 = arith.constant 0 : i32
    return %c0_i32, %c0_i32_0 : i32, i32
  }
  func.func @transform_3(%arg0: i32, %arg1: i32) -> (i32, i32) {
    %c0_i32 = arith.constant 0 : i32
    %c0_i32_0 = arith.constant 0 : i32
    %c0_i32_1 = arith.constant 0 : i32
    return %c0_i32, %c0_i32_0 : i32, i32
  }
  func.func @transform_4(%arg0: i32, %arg1: i32) -> (i32, i32) {
    %c0_i32 = arith.constant 0 : i32
    %c0_i32_0 = arith.constant 0 : i32
    %c0_i32_1 = arith.constant 0 : i32
    return %c0_i32, %c0_i32_0 : i32, i32
  }
  func.func @transform_5(%arg0: i32, %arg1: i32) -> (i32, i32) {
    %c0_i32 = arith.constant 0 : i32
    %c0_i32_0 = arith.constant 0 : i32
    %c0_i32_1 = arith.constant 0 : i32
    return %c0_i32, %c0_i32_0 : i32, i32
  }
  func.func @transform_6(%arg0: i32, %arg1: i32) -> (i32, i32) {
    %c0_i32 = arith.constant 0 : i32
    %c0_i32_0 = arith.constant 0 : i32
    %c0_i32_1 = arith.constant 0 : i32
    return %c0_i32, %c0_i32_0 : i32, i32
  }
  func.func @transform_7(%arg0: i32, %arg1: i32) -> (i32, i32) {
    %c0_i32 = arith.constant 0 : i32
    %c0_i32_0 = arith.constant 0 : i32
    return %c0_i32, %arg1 : i32, i32
  }
  func.func @transform_8(%arg0: i32, %arg1: i32) -> (i32, i32) {
    %c0_i32 = arith.constant 0 : i32
    return %arg0, %arg1 : i32, i32
  }
}

</mosaic_0001>

<bundles_post_ra>
// kernel: tpu_custom_call.1
= control target key start
LH: loop header
LB: loop body
LE: loop exit
PB: predicated region body
PF: predicated region fallthrough
CT: control target
= control target key end

     0   :  { %s1714_s0 = inlined_call_operand.hbm [shape: f32[16,32], index: 0, kind: input, shape index: {}]   ;;  %s1715_s1 = inlined_call_operand.hbm [shape: bf16[32,64], index: 1, kind: input, shape index: {}]   ;;  %s1716_s2 = inlined_call_operand.vmem [shape: f32[1,64], index: 2, kind: input, shape index: {}]   ;;  %s1717_s3 = inlined_call_operand.vmem [shape: bf16[64,64], index: 3, kind: input, shape index: {}]   ;;  %s1718_s4 = inlined_call_operand.vmem [shape: f32[1,64], index: 4, kind: input, shape index: {}]   ;;  %s1719_s5 = inlined_call_operand.vmem [shape: bf16[64,32], index: 5, kind: input, shape index: {}]   ;;  %s1720_s6 = inlined_call_operand.vmem [shape: f32[1,32], index: 6, kind: input, shape index: {}]   ;;  %s1721_s7 = inlined_call_operand.vmem [shape: bf16[32,256], index: 7, kind: input, shape index: {}]   ;;  %s1722_s8 = inlined_call_operand.hbm [shape: f32[16,256], index: 8, kind: output, shape index: {}]  }
   0x1   :  { %1739 = sst [smem:[#allocation23_spill]] %s1715_s1 }
   0x2   :  { %1740 = sst [smem:[#allocation24_spill]] %s1718_s4 }
   0x3   :  { %1741 = sst [smem:[#allocation25_spill]] %s1719_s5 }
   0x4   :  { %1742 = sst [smem:[#allocation26_spill]] %s1720_s6 }
   0x5   :  { %1743 = sst [smem:[#allocation27_spill]] %s1722_s8 }
   0x6   :  { %13 = vsyncpa [#allocation4], 0 }
   0x7   :  { %15 = vsyncpa [#allocation4 + $0x1], 0 }
   0x8   :  { %16 = vsyncpa [#allocation7], 0 }
   0x9   :  { %17 = vsyncpa [#allocation5], 0 }
   0xa   :  { %19 = vsyncpa [#allocation5 + $0x1], 0  ;;  %s1369_s27 = smov 0   ;;  %s1371_s28 = smov 0  }
   0xb   :  { %s1373_s29 = smov 0   ;;  %s1375_s30 = smov 0  }
   0xc   :  { %s1377_s9 = smov 0   ;;  %s1379_s10 = smov 0  }
   0xd   :  { %s1381_s11 = smov 0   ;;  %s1383_s12 = smov 0  }
   0xe   :  { %s1385_s13 = smov 0   ;;  %s1387_s14 = smov 0  }
   0xf   :  { %s1389_s15 = smov 0   ;;  %s1391_s16 = smov 0  }
  0x10   :  { %s1393_s17 = smov 0  }
  0x11 LB: > { %1744 = sst [smem:[#allocation13_spill]] %s1265_s27  ;;  %s1723_s18 = sadd.s32 4294967295, %s1313_s17   ;;  %s1313_s17 = sphi %s1393_s17, %s25_s17   ;;  %s1309_s16 = sphi %s1391_s16, %s1798_s16   ;;  %s1305_s15 = sphi %s1389_s15, %s1797_s15   ;;  %s1301_s14 = sphi %s1387_s14, %s1796_s14   ;;  %s1297_s13 = sphi %s1385_s13, %s1795_s13   ;;  %s1293_s12 = sphi %s1383_s12, %s1794_s12   ;;  %s1289_s11 = sphi %s1381_s11, %s1793_s11   ;;  %s1285_s10 = sphi %s1379_s10, %s1792_s10   ;;  %s1281_s9 = sphi %s1377_s9, %s1791_s9   ;;  %s1277_s30 = sphi %s1375_s30, %s1790_s30   ;;  %s1273_s29 = sphi %s1373_s29, %s1782_s29   ;;  %s1269_s28 = sphi %s1371_s28, %s1789_s28   ;;  %s1265_s27 = sphi %s1369_s27, %s1788_s27  }
  0x12   : > { %1745 = sst [smem:[#allocation14_spill]] %s1273_s29  ;;  %s34_s20 = sadd.s32 1, %s1305_s15 }
  0x13   : > { %1746 = sst [smem:[#allocation15_spill]] %s1301_s14  ;;  %s37_s21 = sadd.s32 1, %s1309_s16 }
  0x14   : > { %p35_p0 = scmp.ge.s32.totalorder %s34_s20, 2  ;;  %s44_s22 = sadd.s32 1, %s1293_s12 }
  0x15   : > { %p51_p1 = scmp.ne.s32.totalorder %s1293_s12, %s1289_s11  ;;  %p52_p2 = scmp.eq.s32.totalorder %s1313_s17, 0 }
  0x16   : > { %s1800_s20 = smov (%p35_p0, %s34_s20), 0  ;;  %s1802_s21 = smov (!%p35_p0, %s37_s21), %s1309_s16 }
  0x17   : > { %1747 = sst [smem:[#allocation16_spill]] %s1800_s20  ;;  %p1445_p3 = por %p52_p2, %p51_p1 }
  0x18   : > { %p57_p4 = scmp.ne.s32.totalorder %s1289_s11, %s1285_s10  ;;  %p39_p5 = scmp.ge.s32.totalorder %s1802_s21, 2 }
  0x19   : > { %s1748_s23 = scalar_select %p1445_p3, 1, 0 }
  0x1a   : > { %p1452_p6 = scmp.eq.s32.totalorder %s1723_s18, 0  ;;  %s193_s25 = ssub.s32 %s1305_s15, %s1800_s20 }
  0x1b   : > { %s196_s26 = sadd.s32 1, %s1281_s9  ;;  %s1804_s21 = smov (%p39_p5, %s1802_s21), 0 }
  0x1c   : > { %s1749_s24 = scalar_select %p1452_p6, 1, 0 }
  0x1d   : > { %1750 = sst [smem:[#allocation17_spill]] %s1804_s21  ;;  %p1463_p7 = por %p1452_p6, %p57_p4 }
  0x1e   : > { %p194_p8 = scmp.eq.s32.totalorder %s193_s25, 0  ;;  %s41_s19 = ssub.s32 %s1309_s16, %s1804_s21 }
  0x1f   : > { %s1751_s10 = scalar_select %p1463_p7, 1, 0 }
  0x20   : > { %p203_p9 = scmp.ne.s32.totalorder %s1281_s9, %s1277_s30  ;;  %p42_p10 = scmp.eq.s32.totalorder %s41_s19, 0 }
  0x21   : > { %s221_s18 = sor.u32 %s193_s25, %s41_s19  ;;  %s224_s6 = sadd.s32 1, %s1273_s29 }
  0x22   : > { %s1472_s20 = scalar_select %p194_p8, %s1281_s9, %s196_s26  }
  0x23   : > { %s1475_s8 = scalar_select %p42_p10, %s1293_s12, %s44_s22  }
  0x24   : > { %1752 = sst [smem:[#allocation18_spill]] %s1472_s20  ;;  %p1479_p11 = por %p203_p9, %p52_p2 }
  0x25   : > { %1753 = sst [smem:[#allocation19_spill]] %s1475_s8  ;;  %p222_p12 = scmp.eq.s32.totalorder %s221_s18, 0 }
  0x26   : > { %s1754_s14 = scalar_select %p1479_p11, 1, 0 }
  0x27   : > { %p234_p13 = scmp.ne.s32.totalorder %s1273_s29, %s1269_s28  ;;  %s1756_s21 = sadd.s32 4294967295, %s1313_s17  }
  0x28   : > { %s1487_s4 = scalar_select %p222_p12, %s1273_s29, %s224_s6  }
  0x29   : > { %p235_p0 = scmp.eq.s32.totalorder %s1756_s21, 3  ;;  %p240_p1 = scmp.ne.s32.totalorder %s1269_s28, %s1265_s27 }
  0x2a   : > { %1755 = sst [smem:[#allocation20_spill]] %s1487_s4  ;;  %s1757_s5 = sadd.s32 4294967294, %s1313_s17  }
  0x2b   : > { %p241_p4 = scmp.eq.s32.totalorder %s1757_s5, 3  ;;  %p874_p5 = scmp.ge.s32.totalorder %s1313_s17, 1 }
  0x2c   : > { %p1496_p8 = por %p235_p0, %p234_p13  ;;  %p248_p2 = scmp.lt.s32.totalorder %s1313_s17, 5 }
  0x2d   : > { %p1501_p9 = por %p241_p4, %p240_p1  ;;  %s1315_s6 = smov [#allocation6]  }
  0x2e   : > { %s1758_s19 = scalar_select %p1496_p8, 1, 0 }
  0x2f   : > { %s1760_s22 = scalar_select %p1501_p9, 1, 0 }
  0x30   : > { %1759 = sst [smem:[#allocation21_spill]] %s1758_s19  ;;  %p1505_p10 = pnand %p874_p5, %p248_p2 }
  0x31   : > { %1761 = sst [smem:[#allocation22_spill]] %s1760_s22  ;;  %s260_s21 = sshll.u32 %s1315_s6, 4  ;;  %s261_s21 = int_to_ptr.vmem [resolvable:$true] %s260_s21 }
  0x32   : > { %s1762_s18 = scalar_select %p1505_p10, 1, 0 }
  0x33   : > { %p975_p12 = pneg %p1505_p10  ;;  %s1764_s1 = sld [smem:[#allocation23_spill]] }
  0x35   : > { %p1513_p13 = pnand %p975_p12, %p1452_p6 }
  0x37   : > { %p1117_p1 = pneg %p1513_p13 }
  0x39   : > { %s1115_s8 = scalar_lea.hbm %s1764_s1, 256 }
  0x3a   : > { %p1116_p0 = scmp.ne.s32.totalorder %s1764_s1, %s1115_s8  ;;  %p1122_p2 = scmp.lt.u32.totalorder %s1115_s8, %s1764_s1 }
  0x3c   : > { %p1118_p4 = pnand %p1117_p1, %p1116_p0 }
  0x3e   : > { %p1119_p5 = pneg %p1118_p4 }
  0x40   : > { %p1124_p12 = pnand %p1122_p2, %p1119_p5 }
  0x42   : > { %1127 = shalt.err (!%p1124_p12)
}
  0x43   : > { %s1128_s22 = scalar_lea.vmem %s261_s21, 256  ;;  %p1136_p7 = scmp.lt.s32.totalorder %s261_s21, %s261_s21 }
  0x44   : > { %p1129_p9 = scmp.ne.s32.totalorder %s261_s21, %s1128_s22  ;;  %p1137_p10 = scmp.lt.s32.totalorder %s1128_s22, %s1128_s22 }
  0x46   : > { %p1131_p8 = pnand %p1129_p9, %p1117_p1  ;;  %p1138_p11 = por %p1137_p10, %p1136_p7 }
  0x48   : > { %p1132_p6 = pneg %p1131_p8 }
  0x4a   : > { %p1139_p3 = pnand %p1138_p11, %p1132_p6 }
  0x4c   : > { %1142 = shalt.err (!%p1139_p3)
}
  0x4d   : > { %s1316_s4 = smov 64   ;;  %s1317_s20 = smov 4  }
  0x4e   : > { %978 = dma.hbm_to_vmem [thread:$0]  (!%p1513_p13), %s1764_s1, 256, %s261_s21, [#allocation7], %s1316_s4, %s1316_s4, %s1317_s20  }
  0x4f   : > { %p876_p0 = scmp.ge.s32.totalorder %s1313_s17, 4 }
  0x50   : > { %s289_s8 = sand.u32 (!%p876_p0), 1, %s1293_s12   ;;  %s878_s29 = sshll.u32 (!%p876_p0), %s1309_s16, 7 }
  0x51   : > { %285 = sbr.rel (%p876_p0) target bundleno = 115 (0x73), region = 40  ;;  %s877_s22 = sshll.u32 (!%p876_p0), %s289_s8, 3 }
  0x52   : > { %s1539_s19 = scalar_lea.hbm (!%p876_p0), %s1714_s0, %s878_s29  ;;  %s293_s5 = scalar_lea.vmem (!%p876_p0), [#allocation3], %s877_s22 }
  0x53   : > { %s300_s21 = sshll.u32 (!%p876_p0), %s293_s5, 4  ;;  %s290_s4 = scalar_lea.sflag (!%p876_p0), [#allocation4], %s289_s8  ;;  %s301_s21 = int_to_ptr.vmem [resolvable:$true] %s300_s21 }
  0x54   : > { %s1143_s20 = scalar_lea.hbm (!%p876_p0), %s1539_s19, 128  ;;  %p1765_p6 = scmp.ne.s32.totalorder (!%p876_p0), %s1748_s23, 0 }
  0x55   : > { %p1144_p3 = scmp.ne.s32.totalorder (!%p876_p0), %s1539_s19, %s1143_s20  ;;  %s1147_s1 = scalar_lea.hbm (!%p876_p0), %s1714_s0, 256 }
  0x56   : > { %p1148_p8 = scmp.lt.u32.totalorder (!%p876_p0), %s1539_s19, %s1714_s0  ;;  %p1149_p9 = scmp.lt.u32.totalorder (!%p876_p0), %s1147_s1, %s1143_s20 }
  0x57   : > { %p1145_p7 = pnand (!%p876_p0), %p1144_p3, %p1765_p6  ;;  %p1151_p13 = scmp.lt.u32.totalorder (!%p876_p0), %s1143_s20, %s1539_s19 }
  0x58   : > { %p1150_p10 = por %p1149_p9, %p1148_p8 }
  0x59   : > { %p1146_p11 = pneg %p1145_p7 }
  0x5a   : > { %p1152_p1 = por %p1151_p13, %p1150_p10 }
  0x5c   : > { %p1153_p4 = pnand %p1152_p1, %p1146_p11 }
  0x5e   : > { %1156 = shalt.err (!%p1153_p4)
}
  0x5f   : > { %s1157_s8 = scalar_lea.vmem %s301_s21, 128  ;;  %s1318_s22 = smov [#allocation3]  }
  0x60   : > { %p1158_p5 = scmp.ne.s32.totalorder %s301_s21, %s1157_s8  ;;  %s1161_s6 = sshll.u32 %s1318_s22, 4  ;;  %s1162_s6 = int_to_ptr.vmem [resolvable:$false] %s1161_s6 }
  0x61   : > { %s1163_s5 = scalar_lea.vmem %s1162_s6, 256  ;;  %p1164_p0 = scmp.lt.s32.totalorder %s301_s21, %s1162_s6 }
  0x62   : > { %p1159_p2 = pnand %p1158_p5, %p1765_p6  ;;  %p1165_p3 = scmp.lt.s32.totalorder %s1163_s5, %s1157_s8 }
  0x64   : > { %p1160_p12 = pneg %p1159_p2  ;;  %p1166_p7 = por %p1165_p3, %p1164_p0 }
  0x66   : > { %p1167_p8 = pnand %p1166_p7, %p1160_p12 }
  0x68   : > { %1170 = shalt.err (!%p1167_p8)
}
  0x69   : > { %969 = dma.hbm_to_vmem [thread:$0]  (%p1765_p6), %s1539_s19, 128, %s301_s21, %s290_s4  }
  0x6a   : > { %p1766_p11 = scmp.ne.s32.totalorder %s1754_s14, 0 }
  0x6b   : > { %s308_s1 = sand.u32 (%p1766_p11), 1, %s1281_s9   ;;  %s880_s20 = sshll.u32 (%p1766_p11), %s1305_s15, 2 }
  0x6c   : > { %306 = sbr.rel (!%p1766_p11) target bundleno = 115 (0x73), region = 48  ;;  %s879_s25 = sshll.u32 (%p1766_p11), %s308_s1, 4 }
  0x6d   : > { %s312_s29 = scalar_lea.vmem (%p1766_p11), %s1721_s7, %s880_s20  ;;  %s310_s8 = scalar_lea.vmem (%p1766_p11), [#allocation8], %s879_s25 }
  0x6e   : > { %v328_v0 = vld [vmem:[%s312_s29] sm:$0xf] (%p1766_p11)  ;;  %v330_v1 = vld [vmem:[%s312_s29 + $0x8] sm:$0xf] (%p1766_p11)  ;;  %v332_v2 = vld [vmem:[%s312_s29 + $0x10] sm:$0xf] (%p1766_p11) }
  0x6f   : > { %329 = vst [vmem:[%s310_s8] sm:$0xf] (%p1766_p11), %v328_v0  ;;  %331 = vst [vmem:[%s310_s8 + $0x4] sm:$0xf] (%p1766_p11), %v330_v1  ;;  %v334_v3 = vld [vmem:[%s312_s29 + $0x18] sm:$0xf] (%p1766_p11) }
  0x70   : > { %333 = vst [vmem:[%s310_s8 + $0x8] sm:$0xf] (%p1766_p11), %v332_v2  ;;  %335 = vst [vmem:[%s310_s8 + $0xc] sm:$0xf] (%p1766_p11), %v334_v3 }
  0x73 PF: > { %p1767_p6 = scmp.ne.s32.totalorder %s1762_s18, 0 }
  0x74   : > { %s371_s14 = sand.u32 (!%p1767_p6), 1, %s1289_s11   ;;  %p1768_p9 = scmp.ne.s32.totalorder (!%p1767_p6), %s1751_s10, 0 }
  0x75   : > { %369 = sbr.rel (%p1767_p6) target bundleno = 1218 (0x4c2), region = 89  ;;  %s882_s23 = sshll.u32 (!%p1767_p6), %s371_s14, 3 }
  0x76   : > { %s372_s19 = scalar_lea.sflag (!%p1767_p6), [#allocation4], %s371_s14  ;;  %s375_s21 = scalar_lea.vmem (!%p1767_p6), [#allocation3], %s882_s23 }
  0x7c   : > { %1252 = dma.done.wait (%p1768_p9), %s372_s19, 128  }
  0x7d   : > { %1254 = vsyncadd (%p1768_p9), %s372_s19, 4294967168  ;;  %p1769_p10 = scmp.ne.s32.totalorder %s1749_s24, 0 }
  0x7f   : > { %1256 = dma.done.wait (%p1769_p10), [#allocation7], 256  }
  0x80   : > { %1258 = vsyncadd (%p1769_p10), [#allocation7], 4294967040  ;;  %s385_s18 = sand.u32 1, %s1277_s30   ;;  %s420_s4 = sand.u32 1, %s1269_s28  }
  0x81   : > { %s1578_s22 = sshll.u32 %s385_s18, 4  ;;  %s1582_s6 = sshll.u32 %s420_s4, 3 }
  0x82   : > { %s387_s10 = scalar_lea.vmem [#allocation8], %s1578_s22  ;;  %s422_s5 = scalar_lea.vmem [#allocation9], %s1582_s6 }
  0x83   : > { %p886_p13 = scmp.ne.s32.totalorder %s1297_s13, 0 }
  0x84   : > { %v1097_v4 = vld [vmem:[#allocation6] sm:$0xff] (!%p886_p13)   ;;  %v1319_v5 = vmov (!%p886_p13), 0.0   ;;  %v1098_v6 = vld [vmem:[#allocation6 + $0x8] sm:$0xff] (!%p886_p13)   ;;  %vm1320_vm0 = vmmov (!%p886_p13), 0   ;;  %v428_v7 = vld [vmem:[%s375_s21] sm:$0xff] (!%p886_p13)  ;;  %vm453_vm1 = vcmask (!%p886_p13), 261120  }
  0x85   : > { %427 = sbr.rel (%p886_p13) target bundleno = 982 (0x3d6), region = 105  ;;  %927 = vmatprep.subr.bf16.mxu0 (!%p886_p13), %v1319_v5  ;;  %935 = vmatprep.subr.bf16.mxu1 (!%p886_p13), %v1319_v5  ;;  %v429_v8 = vpack.c.bf16 (!%p886_p13), %v428_v7, %v428_v7  ;;  %v1099_v9 = vld [vmem:[%s1717_s3] sm:$0xff] (!%p886_p13)   ;;  %v1100_v10 = vld [vmem:[%s1717_s3 + $0x8] sm:$0xff] (!%p886_p13)   ;;  %v1101_v11 = vld [vmem:[%s1717_s3 + $0x10] sm:$0xff] (!%p886_p13)   ;;  %vm542_vm2 = vcmask (!%p886_p13), 523264   ;;  %s1770_s21 = sld [smem:[#allocation25_spill]] (!%p886_p13) }
  0x86   : > { %928 = vmatpush3.bf16.msra.mxu0 (!%p886_p13), %v1097_v4  ;;  %931 = vmatprep.mubr.msk.bf16.mxu0 (!%p886_p13), %vm1320_vm0, %v1319_v5  ;;  %v1102_v12 = vld [vmem:[%s1717_s3 + $0x18] sm:$0xff] (!%p886_p13)   ;;  %v887_v13 = vld [vmem:[%s1716_s2] ss:$0 sm:$0xff] (!%p886_p13)  ;;  %s1771_s29 = sld [smem:[#allocation24_spill]] (!%p886_p13)  ;;  %s1772_s23 = sld [smem:[#allocation26_spill]] (!%p886_p13) }
  0x87   : > { %929 = vmatprep.subr.bf16.mxu0 (!%p886_p13), %v1319_v5  ;;  %943 = vmatprep.mubr.msk.bf16.mxu1 (!%p886_p13), %vm1320_vm0, %v1319_v5 }
  0x88   : > { %936 = vmatpush3.bf16.msra.mxu1 (!%p886_p13), %v1099_v9 }
  0x89   : > { %937 = vmatprep.subr.bf16.mxu1 (!%p886_p13), %v1319_v5 }
  0x8a   : > { %930 = vmatpush3.bf16.msra.mxu0 (!%p886_p13), %v1098_v6 }
  0x8b   : > { %947 = vmatprep.subr.bf16.mxu0 (!%p886_p13), %v1319_v5  ;;  %v1103_v25 = vld [vmem:[%s1770_s21] sm:$0xff] (!%p886_p13)   ;;  %v1104_v26 = vld [vmem:[%s1770_s21 + $0x8] sm:$0xff] (!%p886_p13)   ;;  %v1105_v27 = vld [vmem:[%s1770_s21 + $0x10] sm:$0xff] (!%p886_p13)  }
  0x8c   : > { %938 = vmatpush3.bf16.msra.mxu1 %v1100_v10  ;;  %v1106_v28 = vld [vmem:[%s1770_s21 + $0x18] sm:$0xff]   ;;  %v891_v29 = vld [vmem:[%s1771_s29] ss:$0 sm:$0xff] }
  0x8d   : > { %932 = vmatmul.mubr.msk.bf16.vlgmr.msra.gmra.mrb[0].mxu0 %vm453_vm1, %v429_v8  ;;  %939 = vmatprep.subr.bf16.mxu1 %v1319_v5  ;;  %v897_v41 = vld [vmem:[%s1772_s23] ss:$0 sm:$0xff] }
  0x8e   : > { %955 = vmatprep.mubr.msk.bf16.mxu0 %vm1320_vm0, %v1319_v5  ;;  %948 = vmatpush3.bf16.msra.mxu0 %v1103_v25 }
  0x8f   : > { %949 = vmatprep.subr.bf16.mxu0 %v1319_v5 }
  0x90   : > { %940 = vmatpush3.bf16.msra.mxu1 %v1101_v11 }
  0x91   : > { %941 = vmatprep.subr.bf16.mxu1 %v1319_v5 }
  0x92   : > { %950 = vmatpush3.bf16.msra.mxu0 %v1104_v26 }
  0x93   : > { %951 = vmatprep.subr.bf16.mxu0 %v1319_v5 }
  0x94   : > { %942 = vmatpush3.bf16.msra.mxu1 %v1102_v12 }
  0x96   : > { %952 = vmatpush3.bf16.msra.mxu0 %v1105_v27 }
  0x97   : > { %953 = vmatprep.subr.bf16.mxu0 %v1319_v5 }
  0x9a   : > { %954 = vmatpush3.bf16.msra.mxu0 %v1106_v28 }
 0x160   : > { %v491_v14 = vpop.f32.mrb[0].mxu0 }
 0x161   : > { %v492_v15 = vadd.f32 %v887_v13, %v491_v14  ;;  %v933_v16 = vpop.f32.mrb[1].mxu0 }
 0x162   : > { %v494_v17 = vpop.f32.mrb[2].mxu0 }
 0x163   : > { %v498_v18 = vmul.f32 0.70710677, %v492_v15  ;;  %v934_v19 = vpop.f32.mrb[3].mxu0  ;;  %v497_v21 = vmul.f32 0.5, %v492_v15 }
 0x165   : > { %1107 = verf.f32 %v498_v18 }
 0x16f   : > { %v1108_v20 = vpop.eup %1107 }
 0x170   : > { %v500_v22 = vadd.f32 1.0, %v1108_v20 }
 0x172   : > { %v501_v23 = vmul.f32 %v500_v22, %v497_v21 }
 0x174   : > { %v502_v24 = vpack.c.bf16 %v501_v23, %v501_v23 }
 0x176   : > { %944 = vmatmul.mubr.msk.bf16.vlgmr.msra.gmra.mrb[0].mxu1 %vm542_vm2, %v502_v24 }
 0x249   : > { %v580_v30 = vpop.f32.mrb[0].mxu1 }
 0x24a   : > { %v581_v31 = vadd.f32 %v891_v29, %v580_v30  ;;  %v945_v32 = vpop.f32.mrb[1].mxu1 }
 0x24b   : > { %v583_v33 = vpop.f32.mrb[2].mxu1 }
 0x24c   : > { %v587_v34 = vmul.f32 0.70710677, %v581_v31  ;;  %v946_v35 = vpop.f32.mrb[3].mxu1  ;;  %v586_v37 = vmul.f32 0.5, %v581_v31 }
 0x24e   : > { %1109 = verf.f32 %v587_v34 }
 0x258   : > { %v1110_v36 = vpop.eup %1109 }
 0x259   : > { %v589_v38 = vadd.f32 1.0, %v1110_v36 }
 0x25b   : > { %v590_v39 = vmul.f32 %v589_v38, %v586_v37 }
 0x25d   : > { %v591_v40 = vpack.c.bf16 %v590_v39, %v590_v39 }
 0x25f   : > { %956 = vmatmul.mubr.msk.bf16.vlgmr.msra.gmra.mrb[4].mxu0 %vm542_vm2, %v591_v40 }
 0x332   : > { %v668_v42 = vpop.f32.mrb[4].mxu0 }
 0x333   : > { %v669_v43 = vadd.f32 %v897_v41, %v668_v42  ;;  %v957_v44 = vpop.f32.mrb[5].mxu0 }
 0x334   : > { %v671_v45 = vpop.f32.mrb[6].mxu0 }
 0x335   : > { %v958_v46 = vpop.f32.mrb[7].mxu0  ;;  %v674_v47 = vmul.f32 %v669_v43, %v669_v43 }
 0x337   : > { %v675_v48 = vsel %vm453_vm1, %v674_v47, 0.0 }
 0x338   : > { %676 = vadd.xlane.f32.xlu0 %v675_v48 }
 0x3c5   : > { %v677_v49 = vpop.xlane.xlu0 %676 }
 0x3c6   : > { %v678_v50 = vmax.f32 %v677_v49, 1e-24 }
 0x3c8   : > { %1111 = vrsqrt.f32 %v678_v50 }
 0x3d2   : > { %v1112_v51 = vpop.eup %1111 }
 0x3d3   : > { %v680_v52 = vmul.f32 %v1112_v51, %v669_v43 }
 0x3d5   : > { %681 = vst.msk [vmem:[#allocation2] sm:$0xff] %vm453_vm1, %v680_v52 }
 0x3d6 PF: > { %s1773_s19 = sld [smem:[#allocation15_spill]]  ;;  %v1113_v53 = vld [vmem:[%s387_s10] sm:$0xff]   ;;  %v1321_v54 = vmov 0.0   ;;  %v1114_v55 = vld [vmem:[%s387_s10 + $0x8] sm:$0xff]   ;;  %vm1322_vm3 = vmmov 0   ;;  %s1774_s18 = sld [smem:[#allocation21_spill]] }
 0x3d7   : > { %959 = vmatprep.subr.bf16.mxu0 %v1321_v54  ;;  %963 = vmatprep.mubr.msk.bf16.mxu0 %vm1322_vm3, %v1321_v54  ;;  %vm700_vm4 = vcmask 261120   ;;  %s761_s20 = sshll.u32 %s422_s5, 4  ;;  %s1775_s22 = sld [smem:[#allocation27_spill]]  ;;  %s1638_s20 = int_to_ptr.vmem [resolvable:$true] %s761_s20 }
 0x3d8   : > { %960 = vmatpush3.bf16.msra.mxu0 %v1113_v53  ;;  %s1171_s27 = scalar_lea.vmem %s1638_s20, 128  ;;  %s1323_s29 = smov [#allocation9]  }
 0x3d9   : > { %961 = vmatprep.subr.bf16.mxu0 %v1321_v54  ;;  %p1172_p1 = scmp.ne.s32.totalorder %s1638_s20, %s1171_s27  ;;  %s1175_s8 = sshll.u32 %s1323_s29, 4  ;;  %s1176_s8 = int_to_ptr.vmem [resolvable:$false] %s1175_s8 }
 0x3da   : > { %s1177_s14 = scalar_lea.vmem %s1176_s8, 256  ;;  %p1178_p12 = scmp.lt.s32.totalorder %s1638_s20, %s1176_s8 }
 0x3db   : > { %p1179_p0 = scmp.lt.s32.totalorder %s1177_s14, %s1171_s27 }
 0x3dc   : > { %v682_v56 = vld [vmem:[#allocation2] sm:$0xff]  ;;  %962 = vmatpush3.bf16.msra.mxu0 %v1114_v55  ;;  %s907_s30 = sshll.u32 %s1773_s19, 1  ;;  %p1776_p4 = scmp.ne.s32.totalorder %s1774_s18, 0 }
 0x3dd   : > { %v683_v57 = vpack.c.bf16 %v682_v56, %v682_v56  ;;  %s757_s24 = sadd.s32 %s1297_s13, %s907_s30  ;;  %s746_s13 = scalar_lea.sflag [#allocation5], %s420_s4 }
 0x3de   : > { %s908_s1 = sshll.u32 %s757_s24, 7  ;;  %p1173_p5 = pnand %p1172_p1, %p1776_p4 }
 0x3df   : > { %964 = vmatmul.mubr.msk.bf16.vlgmr.msra.gmra.mrb[0].mxu0 %vm700_vm4, %v683_v57  ;;  %s1636_s10 = scalar_lea.hbm %s1775_s22, %s908_s1  ;;  %p1180_p3 = por %p1179_p0, %p1178_p12 }
 0x3e0   : > { %p1174_p2 = pneg %p1173_p5 }
 0x3e2   : > { %p1181_p7 = pnand %p1180_p3, %p1174_p2 }
 0x4b2   : > { %v738_v58 = vpop.f32.mrb[0].mxu0 }
 0x4b3   : > { %744 = vst [vmem:[%s422_s5] sm:$0xff] %v738_v58  ;;  %v965_v59 = vpop.f32.mrb[1].mxu0 }
 0x4b4   : > { %v741_v60 = vpop.f32.mrb[2].mxu0 }
 0x4b5   : > { %1184 = shalt.err (!%p1181_p7)
}
 0x4b6   : > { %s1185_s4 = scalar_lea.hbm %s1636_s10, 128  ;;  %s1189_s23 = scalar_lea.hbm %s1775_s22, 512 }
 0x4b7   : > { %p1186_p8 = scmp.ne.s32.totalorder %s1636_s10, %s1185_s4  ;;  %p1190_p9 = scmp.lt.u32.totalorder %s1636_s10, %s1775_s22 }
 0x4b8   : > { %p1191_p10 = scmp.lt.u32.totalorder %s1189_s23, %s1185_s4  ;;  %p1193_p1 = scmp.lt.u32.totalorder %s1185_s4, %s1636_s10 }
 0x4b9   : > { %p1187_p11 = pnand %p1186_p8, %p1776_p4 }
 0x4ba   : > { %p1192_p13 = por %p1191_p10, %p1190_p9 }
 0x4bb   : > { %p1188_p6 = pneg %p1187_p11 }
 0x4bc   : > { %p1194_p5 = por %p1193_p1, %p1192_p13 }
 0x4be   : > { %p1195_p2 = pnand %p1194_p5, %p1188_p6 }
 0x4c0   : > { %1198 = shalt.err (!%p1195_p2)
}
 0x4c1   : > { %973 = dma.vmem_to_hbm [thread:$0]  (%p1776_p4), %s1638_s20, 128, %s1636_s10, %s746_s13   ;;  %v966_v61 = vpop.f32.mrb[3].mxu0 }
 0x4c2 PF: > { %s1777_s24 = sld [smem:[#allocation13_spill]]  ;;  %s1778_s1 = sld [smem:[#allocation22_spill]] }
 0x4c3   : > { %p985_p12 = scmp.ge.s32.totalorder %s1313_s17, 2 }
 0x4c8   : > { %s773_s25 = sand.u32 1, %s1777_s24   ;;  %p1779_p0 = scmp.ne.s32.totalorder %s1778_s1, 0 }
 0x4c9   : > { %s774_s26 = scalar_lea.sflag [#allocation5], %s773_s25 }
 0x4ca   : > { %p980_p3 = pnand %p985_p12, %p1779_p0 }
 0x4cc   : > { %1260 = dma.done.wait (!%p980_p3), %s774_s26, 128  }
 0x4cd   : > { %1262 = vsyncadd (!%p980_p3), %s774_s26, 4294967168  ;;  %s25_s17 = sadd.s32 1, %s1313_s17   ;;  %s1781_s18 = sld [smem:[#allocation14_spill]] }
 0x4ce   : > { %p1670_p7 = scmp.ge.s32.totalorder %s25_s17, 6   ;;  %s1782_s29 = sld [smem:[#allocation20_spill]] }
 0x4cf   : > { %s1783_s20 = sld [smem:[#allocation18_spill]]  ;;  %s1784_s13 = sld [smem:[#allocation19_spill]] }
 0x4d0   : > { %s1785_s8 = sld [smem:[#allocation16_spill]]  ;;  %s1786_s4 = sld [smem:[#allocation17_spill]] }
 0x4d1   : > { %s1788_s27 = smov %s1269_s28  ;;  %s1790_s30 = smov %s1281_s9 }
 0x4d2   : > { %s1792_s10 = smov %s1289_s11  ;;  %s1793_s11 = smov %s1293_s12 }
 0x4d3   : > { %s1789_s28 = smov %s1781_s18  ;;  %s1796_s14 = smov %s1309_s16 }
 0x4d4   :  { %24 = sbr.rel (!%p1670_p7) target bundleno = 17 (0x11), region = 154 }
 0x4d5   : > { %s1791_s9 = smov %s1783_s20  ;;  %s1794_s12 = smov %s1784_s13 }
 0x4d6   : > { %s1795_s13 = smov %s1305_s15  ;;  %s1797_s15 = smov %s1785_s8 }
 0x4d7   : > { %s1798_s16 = smov %s1786_s4 }
 0x4db   :  { %779 = vsyncpa [#allocation4], 1 }
 0x4dc   :  { %781 = vsyncpa [#allocation4 + $0x1], 1 }
 0x4dd   :  { %782 = vsyncpa [#allocation7], 1 }
 0x4de   :  { %783 = vsyncpa [#allocation5], 1 }
 0x4df   :  { %785 = vsyncpa [#allocation5 + $0x1], 1 }

</bundles_post_ra>
